<compile_context>
chip_gen: v7x
topology: tpu7x:2x2x1
jax: 0.10.0
libtpu: 0.0.40
codegen_flags: <defaults>
</compile_context>

<pallas_src>
import functools
import math

import jax
import jax.numpy as jnp
from jax.experimental import pallas as pl
from jax.experimental.pallas import tpu as pltpu


# ----------------------------------------------------------------------------
# Tiling helpers
# ----------------------------------------------------------------------------
def _batch_tile(n, rows_per_item, target_rows=256):
    """Largest divisor nb of n with nb*rows_per_item <= ~target_rows, keeping the grid
    length >= 2 whenever n >= 2 (so both v7x TensorCores get work on 'parallel' axes)."""
    limit = max(1, target_rows // max(1, rows_per_item))
    if n >= 2:
        limit = min(limit, max(1, n // 2))
    best = 1
    for d in range(1, n + 1):
        if n % d == 0 and d <= limit:
            best = d
    return best


def _const_index_map(rank):
    def im(i, _rank=rank):
        return (0,) * _rank
    return im


def _const_spec(a):
    """Whole-array block with a constant index map: weight stays VMEM resident."""
    # TODO(synk): on v7x (64 MiB VMEM) add pipeline_mode=pl.Buffered(1) so never-changing
    # weight blocks are single-buffered; left at the default here for maximum portability.
    return pl.BlockSpec(a.shape, _const_index_map(len(a.shape)))


def _erf(x):
    """erf via Abramowitz & Stegun 7.1.26 (|err| < 1.5e-7 ~ f32 eps).  Uses only
    mul/add/div/exp so it lowers on VPU+EUP without relying on a native erf rule."""
    ax = jnp.abs(x)
    t = 1.0 / (1.0 + 0.3275911 * ax)
    poly = ((((1.061405429 * t - 1.453152027) * t + 1.421413741) * t
             - 0.284496736) * t + 0.254829592) * t
    y = 1.0 - poly * jnp.exp(-ax * ax)
    return jnp.where(x >= 0, y, -y)


def _gelu(x):
    # Exact (erf-based) GELU to match torch.nn.GELU() default.
    # TODO(synk): on v5e consider the tanh-approx GELU (EUP tanh) if tolerance allows.
    return 0.5 * x * (1.0 + _erf(x * (1.0 / math.sqrt(2.0))))


# ----------------------------------------------------------------------------
# Pallas kernels
# ----------------------------------------------------------------------------
def _patch_embed_kernel(x_ref, w_ref, b_ref, pos_ref, o_ref):
    """o = reshape(x,(nb*L,K)) @ W + b + pos   (W pre-cast bf16, f32 accumulation)."""
    nb, L, K = x_ref.shape
    E = w_ref.shape[1]
    x2 = x_ref[...].reshape(nb * L, K).astype(jnp.bfloat16)
    y = jnp.dot(x2, w_ref[...], preferred_element_type=jnp.float32)
    o_ref[...] = y.reshape(nb, L, E) + b_ref[...] + pos_ref[...][None]


def patch_embed(xp, w, b, pos):
    N, L, K = xp.shape
    E = w.shape[1]
    nb = _batch_tile(N, L)
    w_bf = w.astype(jnp.bfloat16)                     # pre-cast outside the kernel
    return pl.pallas_call(
        _patch_embed_kernel,
        out_shape=jax.ShapeDtypeStruct((N, L, E), jnp.float32),
        grid=(N // nb,),
        in_specs=[
            pl.BlockSpec((nb, L, K), lambda i: (i, 0, 0)),
            _const_spec(w_bf), _const_spec(b), _const_spec(pos),
        ],
        out_specs=pl.BlockSpec((nb, L, E), lambda i: (i, 0, 0)),
        compiler_params=pltpu.CompilerParams(dimension_semantics=("parallel",)),
    )(xp, w_bf, b, pos)


def _ln_linear_kernel(x_ref, g_ref, b_ref, w_ref, wb_ref, o_ref):
    """Fused LayerNorm + linear:  y = LN(x) @ W + wb   (bf16 weights, f32 accumulate)."""
    x = x_ref[...]
    m = jnp.mean(x, axis=-1, keepdims=True)
    var = jnp.mean((x - m) ** 2, axis=-1, keepdims=True)
    h = (x - m) * jax.lax.rsqrt(var + 1e-5) * g_ref[...] + b_ref[...]
    o_ref[...] = (
        jnp.dot(h.astype(jnp.bfloat16), w_ref[...], preferred_element_type=jnp.float32)
        + wb_ref[...]
    )


def ln_linear(x2d, g, b, w, wb):
    """Row-tiled fused LN+Linear; robust to M not divisible by the tile (pads rows)."""
    M, E = x2d.shape
    Nout = w.shape[1]
    w_bf = w.astype(jnp.bfloat16)
    tm = 256 if M >= 256 else max(8, ((M + 7) // 8) * 8)
    Mp = ((M + tm - 1) // tm) * tm
    xin = jnp.pad(x2d, ((0, Mp - M), (0, 0))) if Mp != M else x2d
    out = pl.pallas_call(
        _ln_linear_kernel,
        out_shape=jax.ShapeDtypeStruct((Mp, Nout), jnp.float32),
        grid=(Mp // tm,),
        in_specs=[
            pl.BlockSpec((tm, E), lambda i: (i, 0)),
            _const_spec(g), _const_spec(b), _const_spec(w_bf), _const_spec(wb),
        ],
        out_specs=pl.BlockSpec((tm, Nout), lambda i: (i, 0)),
        compiler_params=pltpu.CompilerParams(dimension_semantics=("parallel",)),
    )(xin, g, b, w_bf, wb)
    return out[:M]


def _transformer_block_kernel(
    x_ref, ln_ref, wqkv_ref, bqkv_ref, wo_ref, bo_ref,
    w1_ref, b1_ref, w2_ref, b2_ref, o_ref,
    *, num_heads, head_dim,
):
    nb, S, E = x_ref.shape
    H, dh = num_heads, head_dim
    M = nb * S
    f32, bf16 = jnp.float32, jnp.bfloat16

    x = x_ref[...]                         # (nb, S, E) f32
    ln = ln_ref[...]                       # (4, E): [ln1_g, ln1_b, ln2_g, ln2_b]

    def layer_norm(v, g, b):
        mu = jnp.mean(v, axis=-1, keepdims=True)
        var = jnp.mean((v - mu) ** 2, axis=-1, keepdims=True)
        return (v - mu) * jax.lax.rsqrt(var + 1e-5) * g + b

    # ---- LN1 + fused QKV projection: one (M, E) @ (E, 3E) MXU matmul.  The attention
    #      scale 1/sqrt(embed_size) is pre-folded into the q columns by the wrapper. ----
    h = layer_norm(x, ln[0:1], ln[1:2]).reshape(M, E)
    qkv = jnp.dot(h.astype(bf16), wqkv_ref[...], preferred_element_type=f32) + bqkv_ref[...]
    qkv = qkv.astype(bf16)                 # (M, 3E)

    # Split into per-head tensors via static lane slices (no in-kernel transposes), then
    # fold heads into the leading batch dim for the batched score/context matmuls.
    q = jnp.concatenate(
        [qkv[:, hh * dh:(hh + 1) * dh].reshape(nb, S, dh) for hh in range(H)], axis=0)
    k = jnp.concatenate(
        [qkv[:, E + hh * dh:E + (hh + 1) * dh].reshape(nb, S, dh) for hh in range(H)], axis=0)
    v = jnp.concatenate(
        [qkv[:, 2 * E + hh * dh:2 * E + (hh + 1) * dh].reshape(nb, S, dh) for hh in range(H)],
        axis=0)                            # (H*nb, S, dh) each, head-major

    s = jnp.einsum("bqd,bkd->bqk", q, k, preferred_element_type=f32)     # (H*nb, S, S)
    s = s - jnp.max(s, axis=-1, keepdims=True)
    p = jnp.exp(s)
    p = p / jnp.sum(p, axis=-1, keepdims=True)        # exact divide (matches reference)
    ctx = jnp.einsum("bqk,bkd->bqd", p.astype(bf16), v,
                     preferred_element_type=f32).astype(bf16)            # (H*nb, S, dh)

    # Re-assemble heads onto the lane axis -> (M, H*dh=E); single full-width output proj.
    ctx_cat = jnp.concatenate([ctx[hh * nb:(hh + 1) * nb] for hh in range(H)],
                              axis=-1).reshape(M, E)
    attn = jnp.dot(ctx_cat, wo_ref[...], preferred_element_type=f32) + bo_ref[...]
    x = x + attn.reshape(nb, S, E)

    # ---- LayerNorm 2 + MLP (exact-erf GELU) + residual ----
    h2 = layer_norm(x, ln[2:3], ln[3:4]).reshape(M, E)
    u = jnp.dot(h2.astype(bf16), w1_ref[...], preferred_element_type=f32) + b1_ref[...]
    u = _gelu(u)
    u = jnp.dot(u.astype(bf16), w2_ref[...], preferred_element_type=f32) + b2_ref[...]
    o_ref[...] = x + u.reshape(nb, S, E)


def transformer_block(x, p, num_heads):
    N, S, E = x.shape
    H = num_heads
    dh = E // H
    nb = _batch_tile(N, S)

    bf16 = jnp.bfloat16
    scale = 1.0 / math.sqrt(E)             # reference: softmax(energy / sqrt(embed_size))

    # Pack weights OUTSIDE the kernel: fused (pre-scaled) QKV, bf16 casts, packed LN/bias
    # constants so the pallas_call has few, larger constant inputs.
    wqkv = jnp.concatenate([p["wq"] * scale, p["wk"], p["wv"]], axis=1).astype(bf16)  # (E,3E)
    bqkv = jnp.concatenate([p["bq"] * scale, p["bk"], p["bv"]], axis=1)               # (1,3E)
    ln_pack = jnp.concatenate([p["ln1_g"], p["ln1_b"], p["ln2_g"], p["ln2_b"]], axis=0)
    wo = p["wo"].astype(bf16)
    w1 = p["w1"].astype(bf16)
    w2 = p["w2"].astype(bf16)

    consts = [ln_pack, wqkv, bqkv, wo, p["bo"], w1, p["b1"], w2, p["b2"]]
    kern = functools.partial(_transformer_block_kernel, num_heads=H, head_dim=dh)

    # TODO(synk): at production sizes (E>=768, F=4E) add an F-axis grid split for the MLP
    # (accumulator scratch + pl.when finalize) and an explicit vmem_limit_bytes so the
    # fused block fits v7x's 64 MiB VMEM; unnecessary at these sizes.
    return pl.pallas_call(
        kern,
        out_shape=jax.ShapeDtypeStruct((N, S, E), jnp.float32),
        grid=(N // nb,),
        in_specs=[pl.BlockSpec((nb, S, E), lambda i: (i, 0, 0))]
                 + [_const_spec(c) for c in consts],
        out_specs=pl.BlockSpec((nb, S, E), lambda i: (i, 0, 0)),
        compiler_params=pltpu.CompilerParams(dimension_semantics=("parallel",)),
    )(x, *consts)


def _mae_loss_kernel(pred_ref, tgt_ref, mask_ref, o_ref, num_ref, den_ref):
    i = pl.program_id(0)

    @pl.when(i == 0)
    def _():
        num_ref[...] = jnp.zeros_like(num_ref)
        den_ref[...] = jnp.zeros_like(den_ref)

    d = pred_ref[...] - tgt_ref[...]
    per = jnp.mean(d * d, axis=-1, keepdims=True)     # (nb, L, 1)
    m = mask_ref[...]                                 # (nb, L, 1)
    num_ref[...] = num_ref[...] + jnp.sum(per * m)
    den_ref[...] = den_ref[...] + jnp.sum(m)

    @pl.when(i == pl.num_programs(0) - 1)
    def _():
        # Matches the reference `sum / mask.sum()` exactly (mask_ratio=0 => inf/nan there too).
        o_ref[...] = num_ref[...] / den_ref[...]


def mae_loss(pred, target, mask):
    """Streaming masked-MSE reduction tiled over the batch axis."""
    N, L, P = pred.shape
    nb = _batch_tile(N, L)
    mask3 = mask[:, :, None]
    out = pl.pallas_call(
        _mae_loss_kernel,
        out_shape=jax.ShapeDtypeStruct((1, 1), jnp.float32),
        grid=(N // nb,),
        in_specs=[
            pl.BlockSpec((nb, L, P), lambda i: (i, 0, 0)),
            pl.BlockSpec((nb, L, P), lambda i: (i, 0, 0)),
            pl.BlockSpec((nb, L, 1), lambda i: (i, 0, 0)),
        ],
        out_specs=pl.BlockSpec((1, 1), lambda i: (0, 0)),
        scratch_shapes=[pltpu.VMEM((1, 1), jnp.float32),
                        pltpu.VMEM((1, 1), jnp.float32)],
        compiler_params=pltpu.CompilerParams(dimension_semantics=("arbitrary",)),
    )(pred, target, mask3)
    return out[0, 0]


# ----------------------------------------------------------------------------
# Parameter construction (deterministic, synthetic)
# ----------------------------------------------------------------------------
def _init_block(key, E, F):
    ks = jax.random.split(key, 6)
    std = 0.02
    f32 = jnp.float32
    return dict(
        ln1_g=jnp.ones((1, E), f32), ln1_b=jnp.zeros((1, E), f32),
        wq=std * jax.random.normal(ks[0], (E, E), f32), bq=jnp.zeros((1, E), f32),
        wk=std * jax.random.normal(ks[1], (E, E), f32), bk=jnp.zeros((1, E), f32),
        wv=std * jax.random.normal(ks[2], (E, E), f32), bv=jnp.zeros((1, E), f32),
        wo=std * jax.random.normal(ks[3], (E, E), f32), bo=jnp.zeros((1, E), f32),
        ln2_g=jnp.ones((1, E), f32), ln2_b=jnp.zeros((1, E), f32),
        w1=std * jax.random.normal(ks[4], (E, F), f32), b1=jnp.zeros((1, F), f32),
        w2=std * jax.random.normal(ks[5], (F, E), f32), b2=jnp.zeros((1, E), f32),
    )


def init_params(key, cfg):
    E, De = cfg["embed_size"], cfg["decoder_embed_size"]
    C, p = cfg["num_channels"], cfg["patch_size"]
    L = (cfg["image_size"] // p) ** 2
    F = cfg["forward_expansion"] * E
    Fd = cfg["forward_expansion"] * De
    f32 = jnp.float32
    keys = jax.random.split(key, 8 + cfg["encod_hidden_layers"] + cfg["decod_hidden_layers"])
    std = 0.02
    params = dict(
        patch_w=std * jax.random.normal(keys[0], (C * p * p, E), f32),
        patch_b=jnp.zeros((1, E), f32),
        cls_token=std * jax.random.normal(keys[1], (1, 1, E), f32),
        pos_emb=std * jax.random.normal(keys[2], (1, L + 1, E), f32),
        enc_ln_g=jnp.ones((1, E), f32), enc_ln_b=jnp.zeros((1, E), f32),
        dec_embed_w=std * jax.random.normal(keys[3], (E, De), f32),
        dec_embed_b=jnp.zeros((1, De), f32),
        mask_token=jnp.zeros((1, 1, De), f32),
        dec_pos_emb=jnp.zeros((1, L + 1, De), f32),
        dec_ln_g=jnp.ones((1, De), f32), dec_ln_b=jnp.zeros((1, De), f32),
        dec_pred_w=std * jax.random.normal(keys[4], (De, p * p * C), f32),
        dec_pred_b=jnp.zeros((1, p * p * C), f32),
    )
    params["enc_blocks"] = [
        _init_block(keys[8 + i], E, F) for i in range(cfg["encod_hidden_layers"])
    ]
    params["dec_blocks"] = [
        _init_block(keys[8 + cfg["encod_hidden_layers"] + i], De, Fd)
        for i in range(cfg["decod_hidden_layers"])
    ]
    return params


# ----------------------------------------------------------------------------
# MaskedAutoEncoder forward (loss, decoder_output, mask)
# ----------------------------------------------------------------------------
def mae_forward(params, imgs, mask_ratio, mask_key, cfg):
    N, C, H, W = imgs.shape
    p = cfg["patch_size"]
    E, De = cfg["embed_size"], cfg["decoder_embed_size"]
    h = wdim = H // p
    L = h * wdim

    # ---- PatchEmbedding: conv(stride=kernel=p) as im2col + fused matmul+bias+pos kernel ----
    xp = imgs.reshape(N, C, h, p, wdim, p)
    xp = jnp.transpose(xp, (0, 2, 4, 1, 3, 5))               # (N, h, w, C, p, p)
    xp = xp.reshape(N, L, C * p * p)
    pos1 = params["pos_emb"][0, 1:, :]                       # (L, E)
    x = patch_embed(xp, params["patch_w"], params["patch_b"], pos1)    # (N, L, E), pos added

    # ---- random masking (plain-JAX glue: rand / argsort / gather) ----
    len_keep = int(L * (1 - mask_ratio))
    noise = jax.random.uniform(mask_key, (N, L), dtype=jnp.float32)
    ids_shuffle = jnp.argsort(noise, axis=1)
    ids_restore = jnp.argsort(ids_shuffle, axis=1)
    ids_keep = ids_shuffle[:, :len_keep]
    x_masked = jnp.take_along_axis(x, ids_keep[:, :, None], axis=1)
    mask = jnp.ones((N, L), jnp.float32).at[:, :len_keep].set(0.0)
    mask = jnp.take_along_axis(mask, ids_restore, axis=1)

    cls = jnp.broadcast_to(params["cls_token"], (N, 1, E))
    x = jnp.concatenate([cls, x_masked], axis=1)             # (N, len_keep+1, E)

    # ---- Encoder blocks ----
    for bp in params["enc_blocks"]:
        x = transformer_block(x, bp, cfg["num_heads"])
    S = x.shape[1]

    # ---- Encoder final LayerNorm fused with decoder_embed linear ----
    d = ln_linear(x.reshape(N * S, E),
                  params["enc_ln_g"], params["enc_ln_b"],
                  params["dec_embed_w"], params["dec_embed_b"])
    d = d.reshape(N, S, De)

    # ---- Decoder token unshuffle (plain-JAX gather/concat glue) ----
    n_mask = L + 1 - S
    mask_tokens = jnp.broadcast_to(params["mask_token"], (N, n_mask, De))
    d_ = jnp.concatenate([d[:, 1:, :], mask_tokens], axis=1)
    d_ = jnp.take_along_axis(d_, ids_restore[:, :, None], axis=1)
    d = jnp.concatenate([d[:, :1, :], d_], axis=1)           # (N, L+1, De)
    d = d + params["dec_pos_emb"]

    for bp in params["dec_blocks"]:
        d = transformer_block(d, bp, cfg["num_heads"])
    Sd = d.shape[1]

    # ---- Decoder final LayerNorm fused with decoder_pred linear ----
    pred = ln_linear(d.reshape(N * Sd, De),
                     params["dec_ln_g"], params["dec_ln_b"],
                     params["dec_pred_w"], params["dec_pred_b"])
    pred = pred.reshape(N, Sd, p * p * C)[:, 1:, :]           # drop cls -> (N, L, p*p*C)

    # ---- loss: patchify target (order nchpwq->nhwpqc) + tiled masked-MSE kernel ----
    # TODO(synk): fuse the target patchify transpose into the loss kernel (index_map over
    # patches) to save one HBM pass of the target tensor at production image sizes.
    t = imgs.reshape(N, C, h, p, wdim, p)
    t = jnp.transpose(t, (0, 2, 4, 3, 5, 1))                  # (N, h, w, p, p, C)
    target = t.reshape(N, L, p * p * C)
    # TODO(synk): norm_pix_loss=True branch not implemented (reference default is False).
    loss = mae_loss(pred, target, mask)
    return loss, pred, mask


# ----------------------------------------------------------------------------
if __name__ == "__main__":
    cfg = dict(
        embed_size=32,
        decoder_embed_size=32,
        patch_size=4,
        image_size=16,
        num_channels=3,
        num_heads=4,
        forward_expansion=2,
        encod_hidden_layers=1,
        decod_hidden_layers=1,
    )
    key = jax.random.PRNGKey(0)
    k_param, k_img, k_mask = jax.random.split(key, 3)

    params = init_params(k_param, cfg)
    imgs = jax.random.normal(
        k_img, (2, cfg["num_channels"], cfg["image_size"], cfg["image_size"]),
        dtype=jnp.float32,
    )

    loss, pred, mask = mae_forward(params, imgs, 0.75, k_mask, cfg)
    jax.block_until_ready((loss, pred, mask))

    assert pred.shape == (2, 16, cfg["patch_size"] ** 2 * cfg["num_channels"])
    assert mask.shape == (2, 16)
    assert loss.shape == ()
    print("KERNEL_OK")
</pallas_src>

<mosaic_0001>
module attributes {stable_mosaic.version = 11 : i64} {
  func.func @_patch_embed_kernel(%arg0: i32, %arg1: memref<1x16x48xf32, #tpu.memory_space<vmem>>, %arg2: memref<48x32xbf16, #tpu.memory_space<vmem>>, %arg3: memref<1x32xf32, #tpu.memory_space<vmem>>, %arg4: memref<16x32xf32, #tpu.memory_space<vmem>>, %arg5: memref<1x16x32xf32, #tpu.memory_space<vmem>>) attributes {dimension_semantics = [#tpu.dimension_semantics<parallel>], iteration_bounds = array<i64: 2>, scalar_prefetch = 0 : i64, scratch_operands = 0 : i64, tpu.core_type = #tpu.core_type<tc>, window_params = [{transform_indices = @transform_0, window_bounds = array<i64: 1, 16, 48>}, {pipeline_mode = #tpu.pipeline_mode<synchronous>, transform_indices = @transform_1, window_bounds = array<i64: 48, 32>}, {pipeline_mode = #tpu.pipeline_mode<synchronous>, transform_indices = @transform_2, window_bounds = array<i64: 1, 32>}, {pipeline_mode = #tpu.pipeline_mode<synchronous>, transform_indices = @transform_3, window_bounds = array<i64: 16, 32>}, {transform_indices = @transform_4, window_bounds = array<i64: 1, 16, 32>}]} {
    %c0 = arith.constant 0 : index
    %c0_0 = arith.constant 0 : index
    %c0_1 = arith.constant 0 : index
    %0 = vector.load %arg1[%c0, %c0_0, %c0_1] : memref<1x16x48xf32, #tpu.memory_space<vmem>>, vector<1x16x48xf32>
    %1 = vector.shape_cast %0 : vector<1x16x48xf32> to vector<16x48xf32>
    %2 = arith.truncf %1 : vector<16x48xf32> to vector<16x48xbf16>
    %c0_2 = arith.constant 0 : index
    %c0_3 = arith.constant 0 : index
    %3 = vector.load %arg2[%c0_2, %c0_3] : memref<48x32xbf16, #tpu.memory_space<vmem>>, vector<48x32xbf16>
    %cst = arith.constant dense<0.000000e+00> : vector<16x32xf32>
    %4 = tpu.matmul %2, %3, %cst {dimension_numbers = #tpu.dot_dimension_numbers<[1], [0], [0], [1], [0, 0, 1, 1], [], []>} : vector<16x48xbf16>, vector<48x32xbf16>, vector<16x32xf32> -> vector<16x32xf32>
    %5 = vector.shape_cast %4 : vector<16x32xf32> to vector<1x16x32xf32>
    %c0_4 = arith.constant 0 : index
    %c0_5 = arith.constant 0 : index
    %6 = vector.load %arg3[%c0_4, %c0_5] : memref<1x32xf32, #tpu.memory_space<vmem>>, vector<1x32xf32>
    %7 = vector.shape_cast %6 : vector<1x32xf32> to vector<1x1x32xf32>
    %8 = vector.broadcast %7 : vector<1x1x32xf32> to vector<1x16x32xf32>
    %9 = arith.addf %5, %8 : vector<1x16x32xf32>
    %c0_6 = arith.constant 0 : index
    %c0_7 = arith.constant 0 : index
    %10 = vector.load %arg4[%c0_6, %c0_7] : memref<16x32xf32, #tpu.memory_space<vmem>>, vector<16x32xf32>
    %11 = vector.shape_cast %10 : vector<16x32xf32> to vector<1x16x32xf32>
    %12 = arith.addf %9, %11 : vector<1x16x32xf32>
    %c0_8 = arith.constant 0 : index
    %c0_9 = arith.constant 0 : index
    %c0_10 = arith.constant 0 : index
    %13 = vector.load %arg5[%c0_8, %c0_9, %c0_10] : memref<1x16x32xf32, #tpu.memory_space<vmem>>, vector<1x16x32xf32>
    tpu.vector_store %arg5[%c0_8, %c0_9, %c0_10], %12 {strides = array<i32>} : memref<1x16x32xf32, #tpu.memory_space<vmem>>, vector<1x16x32xf32>,
    return
  }
  func.func @transform_0(%arg0: i32) -> (i32, i32, i32) {
    %c0_i32 = arith.constant 0 : i32
    %c0_i32_0 = arith.constant 0 : i32
    %c0_i32_1 = arith.constant 0 : i32
    return %arg0, %c0_i32, %c0_i32_0 : i32, i32, i32
  }
  func.func @transform_1(%arg0: i32) -> (i32, i32) {
    %c0_i32 = arith.constant 0 : i32
    %c0_i32_0 = arith.constant 0 : i32
    %c0_i32_1 = arith.constant 0 : i32
    return %c0_i32, %c0_i32_0 : i32, i32
  }
  func.func @transform_2(%arg0: i32) -> (i32, i32) {
    %c0_i32 = arith.constant 0 : i32
    %c0_i32_0 = arith.constant 0 : i32
    %c0_i32_1 = arith.constant 0 : i32
    return %c0_i32, %c0_i32_0 : i32, i32
  }
  func.func @transform_3(%arg0: i32) -> (i32, i32) {
    %c0_i32 = arith.constant 0 : i32
    %c0_i32_0 = arith.constant 0 : i32
    %c0_i32_1 = arith.constant 0 : i32
    return %c0_i32, %c0_i32_0 : i32, i32
  }
  func.func @transform_4(%arg0: i32) -> (i32, i32, i32) {
    %c0_i32 = arith.constant 0 : i32
    %c0_i32_0 = arith.constant 0 : i32
    %c0_i32_1 = arith.constant 0 : i32
    return %arg0, %c0_i32, %c0_i32_0 : i32, i32, i32
  }
}

</mosaic_0001>

<bundles_post_ra>
// kernel: tpu_custom_call.1
= control target key start
LH: loop header
LB: loop body
LE: loop exit
PB: predicated region body
PF: predicated region fallthrough
CT: control target
= control target key end

     0   :  { %9 = vsyncpa [#allocation3], 0  ;;  %s655_s0 = inlined_call_operand.vmem [shape: f32[2,16,48], index: 0, kind: input, shape index: {}]   ;;  %s656_s1 = inlined_call_operand.vmem [shape: bf16[48,32], index: 1, kind: input, shape index: {}]   ;;  %s657_s2 = inlined_call_operand.vmem [shape: f32[1,32], index: 2, kind: input, shape index: {}]   ;;  %s658_s3 = inlined_call_operand.vmem [shape: f32[16,32], index: 3, kind: input, shape index: {}]   ;;  %s659_s4 = inlined_call_operand.hbm [shape: f32[2,16,32], index: 4, kind: output, shape index: {}]  }
   0x1   :  { %11 = vsyncpa [#allocation3 + $0x1], 0  ;;  %s534_s15 = smov 0   ;;  %s536_s16 = smov 0  }
   0x2   :  { %s538_s17 = smov 0   ;;  %s540_s18 = smov 0  }
   0x3 LB: > { %s555_s19 = sadd.s32 4294967295, %s502_s18   ;;  %s361_s20 = sadd.s32 4294967294, %s502_s18   ;;  %s502_s18 = sphi %s540_s18, %s665_s18   ;;  %s498_s17 = sphi %s538_s17, %s664_s17   ;;  %s494_s16 = sphi %s536_s16, %s663_s16   ;;  %s490_s15 = sphi %s534_s15, %s662_s15  }
   0x4   : > { %s559_s21 = sadd.s32 1, %s502_s18   ;;  %s113_s22 = sadd.s32 1, %s498_s17 }
   0x5   : > { %s110_s23 = ssub.s32 %s502_s18, %s559_s21  ;;  %p123_p0 = scmp.ne.s32.totalorder %s498_s17, %s494_s16 }
   0x6   : > { %p111_p1 = scmp.eq.s32.totalorder %s110_s23, 0  ;;  %p124_p2 = scmp.eq.s32.totalorder %s555_s19, 1 }
   0x7   : > { %p129_p3 = scmp.ne.s32.totalorder %s494_s16, %s490_s15  ;;  %p130_p4 = scmp.eq.s32.totalorder %s361_s20, 1 }
   0x8   : > { %s570_s24 = scalar_select %p111_p1, %s498_s17, %s113_s22  }
   0x9   : > { %p572_p5 = por %p124_p2, %p123_p0  ;;  %p576_p6 = por %p130_p4, %p129_p3 }
   0xa   : > { %p364_p7 = scmp.ge.s32.totalorder %s502_s18, 1  ;;  %p165_p8 = scmp.lt.s32.totalorder %s502_s18, 3 }
   0xc   : > { %p166_p9 = pnand %p364_p7, %p165_p8 }
   0xd   : > { %v437_v0 = vld [vmem:[%s656_s1] sm:$0xff] (!%p166_p9)   ;;  %v504_v1 = vmov (!%p166_p9), 0.0   ;;  %v438_v2 = vld [vmem:[%s656_s1 + $0x8] sm:$0xff] (!%p166_p9)   ;;  %vm505_vm0 = vmmov (!%p166_p9), 0   ;;  %p191_p10 = scmp.lt.s32.totalorder (!%p166_p9), %s555_s19, 1  ;;  %v439_v3 = vld [vmem:[%s656_s1 + $0x10] sm:$0xff] (!%p166_p9)  }
   0xe   : > { %169 = sbr.rel (%p166_p9) target bundleno = 261 (0x105), region = 36  ;;  %384 = vmatprep.subr.bf16.mxu0 (!%p166_p9), %v504_v1  ;;  %390 = vmatprep.mubr.msk.bf16.mxu0 (!%p166_p9), %vm505_vm0, %v504_v1  ;;  %vm224_vm1 = vcmask (!%p166_p9), 392192   ;;  %s188_s12 = sand.u32 (!%p166_p9), 1, %s494_s16   ;;  %v372_v7 = vld [vmem:[%s657_s2] ss:$0 sm:$0xff] (!%p166_p9)  ;;  %vm282_vm2 = vcmask (!%p166_p9), 261120  }
   0xf   : > { %385 = vmatpush3.bf16.msra.mxu0 (!%p166_p9), %v437_v0  ;;  %s365_s13 = sshll.u32 (!%p166_p9), %s188_s12, 4  ;;  %v278_v9 = vld [vmem:[%s658_s3] sm:$0xff] (!%p166_p9)  ;;  %s379_s29 = sshll.u32 (!%p166_p9), %s555_s19, 8  ;;  %v279_v13 = vld [vmem:[%s658_s3 + $0x8] sm:$0xff] (!%p166_p9) }
  0x10   : > { %386 = vmatprep.subr.bf16.mxu0 (!%p166_p9), %v504_v1  ;;  %s190_s27 = scalar_lea.vmem (!%p166_p9), [#allocation2], %s365_s13  ;;  %s506_s10 = smov (!%p166_p9), [#allocation2]  }
  0x11   : > { %s299_s28 = sshll.u32 (!%p166_p9), %s190_s27, 4  ;;  %s612_s28 = int_to_ptr.vmem [resolvable:$true] %s299_s28 }
  0x12   : > { %s440_s9 = scalar_lea.vmem (!%p166_p9), %s612_s28, 256 }
  0x13   : > { %387 = vmatpush3.bf16.msra.mxu0 (!%p166_p9), %v438_v2  ;;  %p441_p11 = scmp.ne.s32.totalorder (!%p166_p9), %s612_s28, %s440_s9 }
  0x14   : > { %388 = vmatprep.subr.bf16.mxu0 (!%p166_p9), %v504_v1 }
  0x15   : > { %s192_s5 = scalar_select %p191_p10, %s555_s19, 1 }
  0x16   : > { %s614_s19 = scalar_lea.sflag [#allocation3], %s188_s12  ;;  %p442_p12 = pnand %p441_p11, %p572_p5 }
  0x17   : > { %s378_s8 = sshll.u32 %s192_s5, 4  ;;  %389 = vmatpush3.bf16.msra.mxu0 %v439_v3 }
  0x18   : > { %s195_s11 = scalar_lea.vmem %s655_s0, %s378_s8  ;;  %s610_s8 = scalar_lea.hbm %s659_s4, %s379_s29 }
  0x19   : > { %v197_v4 = vld [vmem:[%s195_s11] sm:$0xff]  ;;  %v198_v5 = vld [vmem:[%s195_s11 + $0x8] sm:$0xff]  ;;  %p443_p13 = pneg %p442_p12  ;;  %s444_s11 = sshll.u32 %s506_s10, 4  ;;  %s445_s11 = int_to_ptr.vmem [resolvable:$false] %s444_s11 }
  0x1a   : > { %v199_v6 = vpack.c.bf16 %v198_v5, %v197_v4  ;;  %s446_s13 = scalar_lea.vmem %s445_s11, 512  ;;  %p447_p0 = scmp.lt.s32.totalorder %s612_s28, %s445_s11 }
  0x1b   : > { %p448_p1 = scmp.lt.s32.totalorder %s446_s13, %s440_s9 }
  0x1c   : > { %391 = vmatmul.mubr.msk.bf16.vlgmr.msra.gmra.mrb[0].mxu0 %vm224_vm1, %v199_v6 }
  0x1d   : > { %p449_p2 = por %p448_p1, %p447_p0 }
  0x1f   : > { %p450_p3 = pnand %p449_p2, %p443_p13 }
  0xef   : > { %v262_v8 = vpop.f32.mrb[0].mxu0 }
  0xf0   : > { %v276_v10 = vadd.f32 %v372_v7, %v262_v8  ;;  %v392_v11 = vpop.f32.mrb[1].mxu0 }
  0xf1   : > { %v265_v12 = vpop.f32.mrb[2].mxu0 }
  0xf2   : > { %v280_v14 = vadd.f32 %v278_v9, %v276_v10  ;;  %v277_v15 = vadd.f32 %v372_v7, %v265_v12  ;;  %v393_v16 = vpop.f32.mrb[3].mxu0 }
  0xf4   : > { %283 = vst.msk [vmem:[%s190_s27] sm:$0xff] %vm282_vm2, %v280_v14  ;;  %v281_v17 = vadd.f32 %v279_v13, %v277_v15 }
  0xf6   : > { %284 = vst.msk [vmem:[%s190_s27 + $0x8] sm:$0xff] %vm282_vm2, %v281_v17 }
  0xf7   : > { %453 = shalt.err (!%p450_p3)
}
  0xf8   : > { %s454_s12 = scalar_lea.hbm %s610_s8, 256  ;;  %s458_s22 = scalar_lea.hbm %s659_s4, 512 }
  0xf9   : > { %p455_p4 = scmp.ne.s32.totalorder %s610_s8, %s454_s12  ;;  %p459_p9 = scmp.lt.u32.totalorder %s610_s8, %s659_s4 }
  0xfa   : > { %p460_p10 = scmp.lt.u32.totalorder %s458_s22, %s454_s12  ;;  %p462_p12 = scmp.lt.u32.totalorder %s454_s12, %s610_s8 }
  0xfb   : > { %p456_p7 = pnand %p455_p4, %p572_p5 }
  0xfc   : > { %p461_p11 = por %p460_p10, %p459_p9 }
  0xfd   : > { %p457_p8 = pneg %p456_p7 }
  0xfe   : > { %p463_p13 = por %p462_p12, %p461_p11 }
 0x100   : > { %p464_p0 = pnand %p463_p13, %p457_p8 }
 0x102   : > { %467 = shalt.err (!%p464_p0)
}
 0x103   : > { %s507_s29 = smov 128   ;;  %s508_s30 = smov 8  }
 0x104   : > { %394 = dma.vmem_to_hbm [thread:$0]  (%p572_p5), %s612_s28, 256, %s610_s8, %s614_s19, %s507_s29, %s507_s29, %s508_s30  }
 0x105 PF: > { %p400_p1 = scmp.ge.s32.totalorder %s502_s18, 2  ;;  %s314_s5 = sand.u32 1, %s490_s15  }
 0x106   : > { %s315_s6 = scalar_lea.sflag [#allocation3], %s314_s5 }
 0x107   : > { %p397_p2 = pnand %p400_p1, %p576_p6 }
 0x109   : > { %485 = dma.done.wait (!%p397_p2), %s315_s6, 256  }
 0x10a   : > { %487 = vsyncadd (!%p397_p2), %s315_s6, 4294967040  ;;  %p14_p3 = scmp.ge.s32.totalorder %s559_s21, 4   ;;  %s662_s15 = smov %s494_s16 }
 0x10b   : > { %s663_s16 = smov %s498_s17  ;;  %s664_s17 = smov %s570_s24 }
 0x10c   : > { %s665_s18 = smov %s559_s21  ;;  %16 = sbr.rel (!%p14_p3) target bundleno = 3 (0x3), region = 71 }
 0x113   :  { %320 = vsyncpa [#allocation3], 1 }
 0x114   :  { %322 = vsyncpa [#allocation3 + $0x1], 1 }

</bundles_post_ra>
